<compile_context>
chip_gen: v5e
topology: v5e:2x2
jax: 0.10.0
libtpu: 0.0.40
codegen_flags: <defaults>
</compile_context>

<pallas_src>
import functools

import jax
import jax.numpy as jnp
from jax.experimental import pallas as pl
from jax.experimental.pallas import tpu as pltpu

P_DROP = 0.1  # NodeDrop default p


def _device_budgets():
    """(per-tile byte budget, vmem_limit_bytes) tuned per TPU generation."""
    try:
        kind = jax.devices()[0].device_kind.lower()
    except Exception:  # no device info at trace time: conservative defaults
        kind = ""
    if "v7" in kind:   # 64 MiB VMEM/TC, ~3.2 TB/s HBM: big tiles amortize step cost
        return 6 * 1024 * 1024, 48 * 1024 * 1024
    if "v6" in kind:   # 128 MiB VMEM, ~1.4 TB/s HBM
        return 4 * 1024 * 1024, 64 * 1024 * 1024
    if "v5" in kind:   # 128 MiB VMEM, ~0.8 TB/s HBM; lift the 16 MiB default scoped cap
        return 2 * 1024 * 1024, 32 * 1024 * 1024
    return 4 * 1024 * 1024, 48 * 1024 * 1024


def _node_drop_kernel(seed_ref, x_ref, o_ref, *, threshold, tile_n, tile_f):
    i = pl.program_id(0)  # node-tile index (feature-tile index does not affect the mask)

    # Lane-dense (tile_n, 128) slab: every lane of a row carries the same global
    # node index, so the slab encodes one Bernoulli keep-decision per node and is
    # applied to 128-lane feature chunks with a plain select — no lane broadcast,
    # no (tile_n, 1) sublane-major temporaries.
    row = jax.lax.broadcasted_iota(jnp.int32, (tile_n, 128), 0)
    g = (row + i * tile_n).astype(jnp.uint32)

    # Scalar seed mixing stays on the scalar path (one SMEM read + one smul).
    s = seed_ref[0].astype(jnp.uint32) * jnp.uint32(0x9E3779B9)

    # lowbias32-style hash: tile-size independent, pure VPU integer ops.
    h = g ^ s
    h = (h ^ (h >> 16)) * jnp.uint32(0x7FEB352D)
    h = (h ^ (h >> 15)) * jnp.uint32(0x846CA68B)
    h = h ^ (h >> 16)
    keep = h >= jnp.uint32(threshold)  # keep w.p. (1 - p), integer compare

    # Apply the slab across the feature tile in 128-lane chunks; static ref
    # slices are views, so each chunk is load -> select -> lane-dense store.
    nfull, rem = divmod(tile_f, 128)
    for c in range(nfull):
        sl = slice(c * 128, (c + 1) * 128)
        xv = x_ref[:, sl]
        o_ref[:, sl] = jnp.where(keep, xv, jnp.zeros_like(xv))
    if rem:
        sl = slice(nfull * 128, tile_f)
        xv = x_ref[:, sl]
        o_ref[:, sl] = jnp.where(keep[:, :rem], xv, jnp.zeros_like(xv))


def node_drop(x, seed, *, p=P_DROP):
    """x: [N, F] node features; seed: int32[1]. Returns x with dropped node rows zeroed."""
    n, f = x.shape
    itemsize = jnp.dtype(x.dtype).itemsize
    # Perf alignment = dtype sublane packing (hard requirement is only 8 or full dim).
    align = {4: 8, 2: 16, 1: 32}.get(itemsize, 8)

    tile_budget, vmem_limit = _device_budgets()

    # Feature tile: lane-dense multiple of 128 when possible; otherwise the full
    # feature width (BlockSpec needs a 128-multiple last dim or the full dim).
    if f % 128 == 0:
        max_tf = max(128, ((tile_budget // (align * itemsize)) // 128) * 128)
        tf = min(f, max_tf, 4096)  # 4096 also bounds the unrolled chunk loop
    else:
        tf = f
        # TODO(synk): for very wide non-128-multiple F, fold rows in the wrapper so the
        # output last dim becomes a lane-dense 128-multiple instead of one wide block.

    # Node tile: the byte budget drives the row count (double-buffered in+out
    # = 4 x tile_budget of VMEM, well inside the per-generation limits above).
    rows = max(align, tile_budget // max(1, tf * itemsize))
    tn = min(rows, n)
    if tn >= align:
        tn = (tn // align) * align  # multiple of >=8 keeps the (8,128) rule
    else:
        tn = n                      # tiny graphs: block equals the full dim

    # Drop threshold in the uint32 domain: drop iff hash < p * 2^32.
    threshold = min(max(int(round(p * float(1 << 32))), 0), (1 << 32) - 1)
    kernel = functools.partial(_node_drop_kernel, threshold=threshold,
                               tile_n=tn, tile_f=tf)

    grid_spec = pltpu.PrefetchScalarGridSpec(
        num_scalar_prefetch=1,                                  # seed lands in SMEM
        grid=(pl.cdiv(n, tn), pl.cdiv(f, tf)),
        in_specs=[pl.BlockSpec((tn, tf), lambda i, j, seed: (i, j))],
        out_specs=pl.BlockSpec((tn, tf), lambda i, j, seed: (i, j)),
    )

    return pl.pallas_call(
        kernel,
        out_shape=jax.ShapeDtypeStruct((n, f), x.dtype),
        grid_spec=grid_spec,
        compiler_params=pltpu.CompilerParams(
            dimension_semantics=("parallel", "parallel"),       # stateless per-tile mask
            vmem_limit_bytes=vmem_limit,
        ),
    )(seed, x)


if __name__ == "__main__":
    key = jax.random.PRNGKey(0)
    N, F = 64, 128                                              # small graph: 64 nodes, 128-dim feats
    x = jax.random.normal(key, (N, F), dtype=jnp.float32)
    seed = jnp.array([0], dtype=jnp.int32)

    out = node_drop(x, seed, p=P_DROP)
    out = jax.block_until_ready(out)

    # Sanity: every row is either identical to the input row or exactly zero.
    row_kept = jnp.all(out == x, axis=-1)
    row_zero = jnp.all(out == 0.0, axis=-1)
    assert bool(jnp.all(row_kept | row_zero)), "rows must be kept or fully dropped"
    assert out.shape == x.shape and out.dtype == x.dtype

    print("KERNEL_OK")
</pallas_src>

<mosaic_0001>
module attributes {stable_mosaic.version = 11 : i64} {
  func.func @_node_drop_kernel(%arg0: i32, %arg1: i32, %arg2: memref<1xi32, #tpu.memory_space<smem>>, %arg3: memref<64x128xf32, #tpu.memory_space<vmem>>, %arg4: memref<64x128xf32, #tpu.memory_space<vmem>>) attributes {dimension_semantics = [#tpu.dimension_semantics<parallel>, #tpu.dimension_semantics<parallel>], iteration_bounds = array<i64: 1, 1>, scalar_prefetch = 1 : i64, scratch_operands = 0 : i64, tpu.core_type = #tpu.core_type<tc>, window_params = [{transform_indices = @transform_0, window_bounds = array<i64: 64, 128>}, {transform_indices = @transform_1, window_bounds = array<i64: 64, 128>}]} {
    %0 = tpu.iota {dimensions = array<i32: 0>} : vector<64x128xi32>
    %c64_i32 = arith.constant 64 : i32
    %1 = arith.muli %arg0, %c64_i32 : i32
    %2 = vector.broadcast %1 : i32 to vector<64x128xi32>
    %3 = arith.addi %0, %2 : vector<64x128xi32>
    %c0 = arith.constant 0 : index
    %4 = memref.load %arg2[%c0] : memref<1xi32, #tpu.memory_space<smem>>
    %c-1640531527_i32 = arith.constant -1640531527 : i32
    %5 = arith.muli %4, %c-1640531527_i32 : i32
    %6 = vector.broadcast %5 : i32 to vector<64x128xi32>
    %7 = arith.xori %3, %6 : vector<64x128xi32>
    %c16_i32 = arith.constant 16 : i32
    %8 = vector.broadcast %c16_i32 : i32 to vector<64x128xi32>
    %9 = arith.shrui %7, %8 : vector<64x128xi32>
    %10 = arith.xori %7, %9 : vector<64x128xi32>
    %c2146121005_i32 = arith.constant 2146121005 : i32
    %11 = vector.broadcast %c2146121005_i32 : i32 to vector<64x128xi32>
    %12 = arith.muli %10, %11 : vector<64x128xi32>
    %c15_i32 = arith.constant 15 : i32
    %13 = vector.broadcast %c15_i32 : i32 to vector<64x128xi32>
    %14 = arith.shrui %12, %13 : vector<64x128xi32>
    %15 = arith.xori %12, %14 : vector<64x128xi32>
    %c-2073254261_i32 = arith.constant -2073254261 : i32
    %16 = vector.broadcast %c-2073254261_i32 : i32 to vector<64x128xi32>
    %17 = arith.muli %15, %16 : vector<64x128xi32>
    %c16_i32_0 = arith.constant 16 : i32
    %18 = vector.broadcast %c16_i32_0 : i32 to vector<64x128xi32>
    %19 = arith.shrui %17, %18 : vector<64x128xi32>
    %20 = arith.xori %17, %19 : vector<64x128xi32>
    %c429496730_i32 = arith.constant 429496730 : i32
    %21 = vector.broadcast %c429496730_i32 : i32 to vector<64x128xi32>
    %22 = arith.cmpi uge, %20, %21 : vector<64x128xi32>
    %c0_1 = arith.constant 0 : index
    %c0_2 = arith.constant 0 : index
    %23 = vector.load %arg3[%c0_1, %c0_2] : memref<64x128xf32, #tpu.memory_space<vmem>>, vector<64x128xf32>
    %cst = arith.constant 0.000000e+00 : f32
    %24 = vector.broadcast %cst : f32 to vector<64x128xf32>
    %25 = arith.select %22, %23, %24 : vector<64x128xi1>, vector<64x128xf32>
    %c0_3 = arith.constant 0 : index
    %c0_4 = arith.constant 0 : index
    %26 = vector.load %arg4[%c0_3, %c0_4] : memref<64x128xf32, #tpu.memory_space<vmem>>, vector<64x128xf32>
    tpu.vector_store %arg4[%c0_3, %c0_4], %25 {strides = array<i32>} : memref<64x128xf32, #tpu.memory_space<vmem>>, vector<64x128xf32>,
    return
  }
  func.func @transform_0(%arg0: i32, %arg1: i32, %arg2: memref<1xi32, #tpu.memory_space<smem>>) -> (i32, i32) {
    %c0_i32 = arith.constant 0 : i32
    return %arg0, %arg1 : i32, i32
  }
  func.func @transform_1(%arg0: i32, %arg1: i32, %arg2: memref<1xi32, #tpu.memory_space<smem>>) -> (i32, i32) {
    %c0_i32 = arith.constant 0 : i32
    return %arg0, %arg1 : i32, i32
  }
}

</mosaic_0001>

<bundles_post_ra>
// kernel: tpu_custom_call.1
= control target key start
LH: loop header
LB: loop body
LE: loop exit
PB: predicated region body
PF: predicated region fallthrough
CT: control target
= control target key end

     0   :  { %8 = vsyncpa [#allocation5], 0  ;;  %s286_s0 = inlined_call_operand.<no memory space> [shape: s32[1], index: 0, kind: input, shape index: {}]   ;;  %s287_s1 = inlined_call_operand.hbm [shape: f32[64,128], index: 1, kind: input, shape index: {}]   ;;  %s288_s2 = inlined_call_operand.hbm [shape: f32[64,128], index: 2, kind: output, shape index: {}]  }
   0x1   :  { %9 = vsyncpa [#allocation6], 0  ;;  %s14_s11 = sshll.u32 %s287_s1, 4  ;;  %s252_s12 = smov [#allocation4]   ;;  %s15_s11 = int_to_ptr.hbm [resolvable:$true] %s14_s11 }
   0x2   :  { %s16_s13 = sshll.u32 %s252_s12, 4  ;;  %s253_s14 = smov 128   ;;  %s17_s13 = int_to_ptr.vmem [resolvable:$true] %s16_s13 }
   0x3   :  { %s254_s15 = smov 8  }
   0x4   :  { %22 = dma.hbm_to_vmem [thread:$0]  %s15_s11, 1024, %s17_s13, [#allocation5], %s253_s14, %s253_s14, %s254_s15  }
   0x5   :  { %248 = dma.done.wait [#allocation5], 1024  }
   0x6   :  { %249 = vsyncadd [#allocation5], 4294966272  ;;  %v27_v0 = vlaneseq  ;;  %s47_s18 = smul.u32 2654435769, %s286_s0  ;;  %s255_s0 = smov [#allocation7]  }
   0x7   :  { %s173_s1 = sshll.u32 %s255_s0, 4  ;;  %s175_s21 = sshll.u32 %s288_s2, 4  ;;  %s174_s1 = int_to_ptr.vmem [resolvable:$true] %s173_s1  ;;  %s176_s21 = int_to_ptr.hbm [resolvable:$true] %s175_s21 }
   0x8   :  { %v28_v1 = vshrl.u32 %v27_v0, 7  ;;  %v48_v2 = vstv %s47_s18 }
   0xa   :  { %v49_v3 = vxor.u32 %v48_v2, %v28_v1  ;;  %v29_v4 = vadd.s32 8, %v28_v1  ;;  %v30_v5 = vadd.s32 16, %v28_v1  ;;  %v31_v6 = vadd.s32 24, %v28_v1 }
   0xb   :  { %v32_v7 = vadd.s32 32, %v28_v1  ;;  %v33_v8 = vadd.s32 40, %v28_v1  ;;  %v34_v9 = vadd.s32 48, %v28_v1  ;;  %v35_v10 = vadd.s32 56, %v28_v1 }
   0xc   :  { %v57_v11 = vshrl.u32 %v49_v3, 16  ;;  %v50_v12 = vxor.u32 %v48_v2, %v29_v4  ;;  %v51_v13 = vxor.u32 %v48_v2, %v30_v5  ;;  %v52_v14 = vxor.u32 %v48_v2, %v31_v6 }
   0xd   :  { %v53_v15 = vxor.u32 %v48_v2, %v32_v7  ;;  %v54_v16 = vxor.u32 %v48_v2, %v33_v8  ;;  %v55_v17 = vxor.u32 %v48_v2, %v34_v9  ;;  %v56_v18 = vxor.u32 %v48_v2, %v35_v10  ;;  %v145_v10 = vld [vmem:[#allocation4] sm:$0xff] }
   0xe   :  { %v65_v19 = vxor.u32 %v57_v11, %v49_v3  ;;  %v58_v20 = vshrl.u32 %v50_v12, 16  ;;  %v59_v21 = vshrl.u32 %v51_v13, 16  ;;  %v60_v22 = vshrl.u32 %v52_v14, 16 }
   0xf   :  { %v61_v23 = vshrl.u32 %v53_v15, 16  ;;  %v62_v24 = vshrl.u32 %v54_v16, 16  ;;  %v63_v25 = vshrl.u32 %v55_v17, 16  ;;  %v64_v26 = vshrl.u32 %v56_v18, 16 }
  0x10   :  { %v73_v27 = vmul.u32 2146121005, %v65_v19  ;;  %v66_v28 = vxor.u32 %v58_v20, %v50_v12  ;;  %v67_v29 = vxor.u32 %v59_v21, %v51_v13  ;;  %v68_v30 = vxor.u32 %v60_v22, %v52_v14  ;;  %v146_v14 = vld [vmem:[#allocation4 + $0x8] sm:$0xff]  ;;  %v148_v22 = vld [vmem:[#allocation4 + $0x18] sm:$0xff] }
  0x11   :  { %v69_v31 = vxor.u32 %v61_v23, %v53_v15  ;;  %v70_v32 = vxor.u32 %v62_v24, %v54_v16  ;;  %v71_v33 = vxor.u32 %v63_v25, %v55_v17  ;;  %v72_v34 = vxor.u32 %v64_v26, %v56_v18  ;;  %v147_v15 = vld [vmem:[#allocation4 + $0x10] sm:$0xff]  ;;  %v149_v23 = vld [vmem:[#allocation4 + $0x20] sm:$0xff] }
  0x12   :  { %v81_v35 = vshrl.u32 %v73_v27, 15  ;;  %v74_v36 = vmul.u32 2146121005, %v66_v28  ;;  %v75_v37 = vmul.u32 2146121005, %v67_v29  ;;  %v150_v29 = vld [vmem:[#allocation4 + $0x28] sm:$0xff] }
  0x13   :  { %v76_v38 = vmul.u32 2146121005, %v68_v30  ;;  %v77_v39 = vmul.u32 2146121005, %v69_v31  ;;  %v78_v40 = vmul.u32 2146121005, %v70_v32 }
  0x14   :  { %v89_v41 = vxor.u32 %v81_v35, %v73_v27  ;;  %v82_v42 = vshrl.u32 %v74_v36, 15  ;;  %v83_v43 = vshrl.u32 %v75_v37, 15  ;;  %v79_v44 = vmul.u32 2146121005, %v71_v33  ;;  %v151_v30 = vld [vmem:[#allocation4 + $0x30] sm:$0xff]  ;;  %v152_v33 = vld [vmem:[#allocation4 + $0x38] sm:$0xff] }
  0x15   :  { %v84_v45 = vshrl.u32 %v76_v38, 15  ;;  %v85_v46 = vshrl.u32 %v77_v39, 15  ;;  %v86_v47 = vshrl.u32 %v78_v40, 15  ;;  %v80_v48 = vmul.u32 2146121005, %v72_v34 }
  0x16   :  { %v97_v49 = vmul.u32 2221713035, %v89_v41  ;;  %v90_v50 = vxor.u32 %v82_v42, %v74_v36  ;;  %v91_v51 = vxor.u32 %v83_v43, %v75_v37  ;;  %v87_v52 = vshrl.u32 %v79_v44, 15 }
  0x17   :  { %v92_v53 = vxor.u32 %v84_v45, %v76_v38  ;;  %v93_v54 = vxor.u32 %v85_v46, %v77_v39  ;;  %v94_v55 = vxor.u32 %v86_v47, %v78_v40  ;;  %v88_v56 = vshrl.u32 %v80_v48, 15 }
  0x18   :  { %v105_v57 = vshrl.u32 %v97_v49, 16  ;;  %v98_v58 = vmul.u32 2221713035, %v90_v50  ;;  %v99_v59 = vmul.u32 2221713035, %v91_v51  ;;  %v95_v60 = vxor.u32 %v87_v52, %v79_v44 }
  0x19   :  { %v100_v61 = vmul.u32 2221713035, %v92_v53  ;;  %v101_v62 = vmul.u32 2221713035, %v93_v54  ;;  %v102_v63 = vmul.u32 2221713035, %v94_v55  ;;  %v96_v0 = vxor.u32 %v88_v56, %v80_v48 }
  0x1a   :  { %v113_v1 = vxor.u32 %v105_v57, %v97_v49  ;;  %v106_v2 = vshrl.u32 %v98_v58, 16  ;;  %v107_v3 = vshrl.u32 %v99_v59, 16  ;;  %v103_v4 = vmul.u32 2221713035, %v95_v60 }
  0x1b   :  { %v108_v5 = vshrl.u32 %v100_v61, 16  ;;  %v109_v6 = vshrl.u32 %v101_v62, 16  ;;  %v110_v7 = vshrl.u32 %v102_v63, 16  ;;  %v104_v8 = vmul.u32 2221713035, %v96_v0 }
  0x1c   :  { %v188_v9 = vxor.u32 2147483648, %v113_v1  ;;  %v114_v11 = vxor.u32 %v106_v2, %v98_v58  ;;  %v115_v12 = vxor.u32 %v107_v3, %v99_v59  ;;  %v111_v13 = vshrl.u32 %v103_v4, 16 }
  0x1d   :  { %v116_v16 = vxor.u32 %v108_v5, %v100_v61  ;;  %v117_v17 = vxor.u32 %v109_v6, %v101_v62  ;;  %v118_v18 = vxor.u32 %v110_v7, %v102_v63  ;;  %v112_v19 = vshrl.u32 %v104_v8, 16 }
  0x1e   :  { %vm123_vm0 = vcmp.ge.s32.totalorder %v188_v9, 2576980378  ;;  %v189_v20 = vxor.u32 2147483648, %v114_v11  ;;  %v190_v21 = vxor.u32 2147483648, %v115_v12  ;;  %v119_v24 = vxor.u32 %v111_v13, %v103_v4 }
  0x1f   :  { %v153_v25 = vsel %vm123_vm0, %v145_v10, 0.0  ;;  %v191_v26 = vxor.u32 2147483648, %v116_v16  ;;  %v192_v27 = vxor.u32 2147483648, %v117_v17  ;;  %v193_v28 = vxor.u32 2147483648, %v118_v18 }
  0x20   :  { %161 = vst [vmem:[#allocation7] sm:$0xff] %v153_v25  ;;  %vm126_vm1 = vcmp.ge.s32.totalorder %v189_v20, 2576980378  ;;  %vm129_vm2 = vcmp.ge.s32.totalorder %v190_v21, 2576980378  ;;  %v194_v31 = vxor.u32 2147483648, %v119_v24  ;;  %v120_v32 = vxor.u32 %v112_v19, %v104_v8 }
  0x21   :  { %v154_v34 = vsel %vm126_vm1, %v146_v14, 0.0  ;;  %v155_v35 = vsel %vm129_vm2, %v147_v15, 0.0  ;;  %vm132_vm3 = vcmp.ge.s32.totalorder %v191_v26, 2576980378  ;;  %vm135_vm4 = vcmp.ge.s32.totalorder %v192_v27, 2576980378 }
  0x22   :  { %162 = vst [vmem:[#allocation7 + $0x8] sm:$0xff] %v154_v34  ;;  %v156_v36 = vsel %vm132_vm3, %v148_v22, 0.0  ;;  %v157_v37 = vsel %vm135_vm4, %v149_v23, 0.0  ;;  %vm138_vm5 = vcmp.ge.s32.totalorder %v193_v28, 2576980378  ;;  %v195_v38 = vxor.u32 2147483648, %v120_v32 }
  0x23   :  { %163 = vst [vmem:[#allocation7 + $0x10] sm:$0xff] %v155_v35  ;;  %v158_v39 = vsel %vm138_vm5, %v150_v29, 0.0  ;;  %vm141_vm6 = vcmp.ge.s32.totalorder %v194_v31, 2576980378 }
  0x24   :  { %164 = vst [vmem:[#allocation7 + $0x18] sm:$0xff] %v156_v36  ;;  %v159_v40 = vsel %vm141_vm6, %v151_v30, 0.0  ;;  %vm144_vm7 = vcmp.ge.s32.totalorder %v195_v38, 2576980378 }
  0x25   :  { %165 = vst [vmem:[#allocation7 + $0x20] sm:$0xff] %v157_v37  ;;  %v160_v41 = vsel %vm144_vm7, %v152_v33, 0.0 }
  0x26   :  { %166 = vst [vmem:[#allocation7 + $0x28] sm:$0xff] %v158_v39 }
  0x27   :  { %167 = vst [vmem:[#allocation7 + $0x30] sm:$0xff] %v159_v40 }
  0x28   :  { %168 = vst [vmem:[#allocation7 + $0x38] sm:$0xff] %v160_v41 }
  0x29   :  { %181 = dma.vmem_to_hbm [thread:$0]  %s174_s1, 1024, %s176_s21, [#allocation6], %s253_s14, %s253_s14, %s254_s15  }
  0x2a   :  { %250 = dma.done.wait [#allocation6], 1024  }
  0x2b   :  { %251 = vsyncadd [#allocation6], 4294966272 }
  0x2c   :  { %186 = vsyncpa [#allocation5], 1 }
  0x2d   :  { %187 = vsyncpa [#allocation6], 1 }

</bundles_post_ra>
